<compile_context>
chip_gen: v5e
topology: v5e:2x2
jax: 0.10.0
libtpu: 0.0.40
codegen_flags: <defaults>
</compile_context>

<pallas_src>
import functools

import jax
import jax.numpy as jnp
from jax.experimental import pallas as pl
from jax.experimental.pallas import tpu as pltpu


def _round_up(x, m):
    return (x + m - 1) // m * m


def _mpnn_kernel(ffd_ref, ffs_ref, adj_ref, ws_ref, bs_ref, wd_ref, bd_ref,
                 wadt_ref, wnagg_ref, out_ref, acc_ref, dstp_ref, adrow_ref, *, hp):
    i = pl.program_id(1)  # src-tile (reduction) index

    # --- once per dst tile: fused dst-side projections + accumulator init -------------
    @pl.when(i == 0)
    def _init():
        ffd = ffd_ref[...]                                          # (TD, D) bf16
        # [ h_d @ W_e_dst + b_e | h_d @ W_n_self + b_n ] -> (TD, Hp + DOUTp) f32
        dstp_ref[...] = (jnp.dot(ffd, wd_ref[...],
                                 preferred_element_type=jnp.float32)
                         + bd_ref[...])
        # attention dst term produced directly as a (1, TD) row (no XLU transpose)
        adrow_ref[...] = jax.lax.dot_general(
            wadt_ref[...], ffd, (((1,), (1,)), ((), ())),
            preferred_element_type=jnp.float32)
        acc_ref[...] = jnp.zeros_like(acc_ref)

    # --- per (dst, src) tile step -------------------------------------------------------
    ffs = ffs_ref[...]                                              # (TS, D) bf16
    # fused src-side projection: [ h_s @ W_e_src | h_s . w_a_src + b_a | pad ]
    srcp = (jnp.dot(ffs, ws_ref[...], preferred_element_type=jnp.float32)
            + bs_ref[...])                                          # (TS, Hp + 128)
    src_m = srcp[:, :hp]                                            # (TS, Hp)
    a_src = srcp[:, hp:hp + 1]                                      # (TS, 1)  (b_a folded in)

    logits = a_src + adrow_ref[...]                                 # (TS, TD)
    gate = adj_ref[...].astype(jnp.float32) * jax.nn.sigmoid(logits)

    dst_mb = dstp_ref[:, :hp]                                       # (TD, Hp) edge-dst + b_e
    # tile-local edge messages; the full (N, N, H) tensor is never materialized
    e = jax.nn.relu(src_m[:, None, :] + dst_mb[None, :, :])         # (TS, TD, Hp)
    # fused gate-and-reduce over the src axis of this tile
    acc_ref[...] += jnp.sum(gate[:, :, None] * e, axis=0)           # (TD, Hp)

    # --- finalize: node model on the aggregated messages --------------------------------
    @pl.when(i == pl.num_programs(1) - 1)
    def _finalize():
        out = jax.nn.relu(
            dstp_ref[:, hp:]                                        # h_d @ W_n_self + b_n
            + jnp.dot(acc_ref[...], wnagg_ref[...],
                      preferred_element_type=jnp.float32))
        out_ref[...] = out.astype(out_ref.dtype)


def func_gc_forward(ff, adj, params):
    """FuncGC.forward(g, ff) -> conv_uff, with g's f2f relation as dense adj[src, dst]."""
    N, D = ff.shape
    H = params["we_src"].shape[1]
    DOUT = params["wn_self"].shape[1]

    # lane-dense padded widths
    Hp = _round_up(H, 128)
    DOUTp = _round_up(DOUT, 128)
    HA = Hp + 128            # src fused width: [we_src | wa_src column | pad]
    HB = Hp + DOUTp          # dst fused width: [we_dst | wn_self]

    # node tiling: <=128 so the (TS, TD, Hp) edge tile stays small in VMEM
    if N <= 128:
        Np = _round_up(N, 8)
        TD = TS = Np
    else:
        Np = _round_up(N, 128)
        TD = TS = 128
    J, I = Np // TD, Np // TS

    f32, bf16 = jnp.float32, jnp.bfloat16

    def pad2(x, r, c):
        return jnp.pad(x, ((0, r - x.shape[0]), (0, c - x.shape[1])))

    ff_p = pad2(ff.astype(f32), Np, D).astype(bf16)        # bf16 MXU input
    adj_p = pad2(adj.astype(f32), Np, Np).astype(bf16)     # 0/1 exact in bf16, halves DMA

    # fused + zero-padded weights (padding keeps the math exact)
    ws = (jnp.zeros((D, HA), f32)
          .at[:, :H].set(params["we_src"])
          .at[:, Hp:Hp + 1].set(params["wa_src"])).astype(bf16)
    bs = jnp.zeros((1, HA), f32).at[:, Hp:Hp + 1].set(params["ba"])
    wd = (jnp.zeros((D, HB), f32)
          .at[:, :H].set(params["we_dst"])
          .at[:, Hp:Hp + DOUT].set(params["wn_self"])).astype(bf16)
    bd = (jnp.zeros((1, HB), f32)
          .at[:, :H].set(params["be"])
          .at[:, Hp:Hp + DOUT].set(params["bn"]))
    wadt = params["wa_dst"].T.astype(bf16)                 # (1, D)
    wnagg = jnp.zeros((Hp, DOUTp), f32).at[:H, :DOUT].set(params["wn_agg"])

    kernel = functools.partial(_mpnn_kernel, hp=Hp)

    out_p = pl.pallas_call(
        kernel,
        out_shape=jax.ShapeDtypeStruct((Np, DOUTp), f32),
        grid_spec=pltpu.PrefetchScalarGridSpec(
            num_scalar_prefetch=0,
            grid=(J, I),                                           # (dst tiles, src tiles)
            in_specs=[
                pl.BlockSpec((TD, D), lambda j, i: (j, 0)),        # ff  (dst rows)
                pl.BlockSpec((TS, D), lambda j, i: (i, 0)),        # ff  (src rows)
                pl.BlockSpec((TS, TD), lambda j, i: (i, j)),       # adj[src, dst] tile
                pl.BlockSpec((D, HA), lambda j, i: (0, 0)),        # fused src weights
                pl.BlockSpec((1, HA), lambda j, i: (0, 0)),        # fused src bias (b_a)
                pl.BlockSpec((D, HB), lambda j, i: (0, 0)),        # fused dst weights
                pl.BlockSpec((1, HB), lambda j, i: (0, 0)),        # fused dst bias (b_e|b_n)
                pl.BlockSpec((1, D), lambda j, i: (0, 0)),         # wa_dst^T row
                pl.BlockSpec((Hp, DOUTp), lambda j, i: (0, 0)),    # wn_agg
            ],
            out_specs=pl.BlockSpec((TD, DOUTp), lambda j, i: (j, 0)),
            scratch_shapes=[
                pltpu.VMEM((TD, Hp), f32),     # agg accumulator
                pltpu.VMEM((TD, HB), f32),     # cached dst projections [edge-dst | node-self]
                pltpu.VMEM((1, TD), f32),      # cached attn dst row
            ],
        ),
        compiler_params=pltpu.CompilerParams(
            dimension_semantics=("parallel", "arbitrary")),
    )(ff_p, ff_p, adj_p, ws, bs, wd, bd, wadt, wnagg)

    return out_p[:N, :DOUT].astype(ff.dtype)


def _ref_forward(ff, adj, params):
    """Pure-JAX reference (matmul inputs bf16-rounded to match the kernel's MXU feed)."""
    bf = lambda x: x.astype(jnp.bfloat16).astype(jnp.float32)
    h = bf(ff)
    src_m = h @ bf(params["we_src"])
    dst_m = h @ bf(params["we_dst"]) + params["be"]
    e = jax.nn.relu(src_m[:, None, :] + dst_m[None, :, :])
    logits = (h @ bf(params["wa_src"])) + (h @ bf(params["wa_dst"])).T + params["ba"][0, 0]
    w = adj * jax.nn.sigmoid(logits)
    agg = jnp.sum(w[:, :, None] * e, axis=0)
    return jax.nn.relu(h @ bf(params["wn_self"]) + agg @ params["wn_agg"] + params["bn"])


if __name__ == "__main__":
    key = jax.random.PRNGKey(0)
    N, D, H, DOUT = 8, 32, 32, 32        # 8 func_group nodes, 32-dim features
    keys = jax.random.split(key, 8)

    # functional group node features
    ff = jax.random.normal(keys[0], (N, D), jnp.float32)

    # deterministic random directed adjacency (no self loops) for the f2f relation
    adj = (jax.random.uniform(keys[1], (N, N)) > 0.5).astype(jnp.float32)
    adj = adj * (1.0 - jnp.eye(N, dtype=jnp.float32))

    def init(k, shape, fan_in):
        return (jax.random.normal(k, shape, jnp.float32)
                / jnp.sqrt(jnp.float32(fan_in)))

    params = dict(
        # edge model: Linear(2D -> H), split into src / dst halves
        we_src=init(keys[2], (D, H), 2 * D),
        we_dst=init(keys[3], (D, H), 2 * D),
        be=jnp.zeros((1, H), jnp.float32),
        # attention model: Linear(2D -> 1), split into src / dst halves
        wa_src=init(keys[4], (D, 1), 2 * D),
        wa_dst=init(keys[5], (D, 1), 2 * D),
        ba=jnp.zeros((1, 1), jnp.float32),
        # node model: Linear(D + H -> DOUT), split into self / agg halves
        wn_self=init(keys[6], (D, DOUT), D + H),
        wn_agg=init(keys[7], (H, DOUT), D + H),
        bn=jnp.zeros((1, DOUT), jnp.float32),
    )

    conv_uff = func_gc_forward(ff, adj, params)
    jax.block_until_ready(conv_uff)
    assert conv_uff.shape == (N, DOUT)

    # loose-tolerance sanity check against a pure-JAX reference
    ref = _ref_forward(ff, adj, params)
    assert jnp.allclose(conv_uff, ref, rtol=1e-1, atol=1e-1), (
        float(jnp.max(jnp.abs(conv_uff - ref))))
    print("KERNEL_OK")
</pallas_src>

<mosaic_0001>
module attributes {stable_mosaic.version = 11 : i64} {
  func.func @_mpnn_kernel(%arg0: i32, %arg1: i32, %arg2: memref<8x32xbf16, #tpu.memory_space<vmem>>, %arg3: memref<8x32xbf16, #tpu.memory_space<vmem>>, %arg4: memref<8x8xbf16, #tpu.memory_space<vmem>>, %arg5: memref<32x256xbf16, #tpu.memory_space<vmem>>, %arg6: memref<1x256xf32, #tpu.memory_space<vmem>>, %arg7: memref<32x256xbf16, #tpu.memory_space<vmem>>, %arg8: memref<1x256xf32, #tpu.memory_space<vmem>>, %arg9: memref<1x32xbf16, #tpu.memory_space<vmem>>, %arg10: memref<128x128xf32, #tpu.memory_space<vmem>>, %arg11: memref<8x128xf32, #tpu.memory_space<vmem>>, %arg12: memref<8x128xf32, #tpu.memory_space<vmem>>, %arg13: memref<8x256xf32, #tpu.memory_space<vmem>>, %arg14: memref<1x8xf32, #tpu.memory_space<vmem>>) attributes {dimension_semantics = [#tpu.dimension_semantics<parallel>, #tpu.dimension_semantics<arbitrary>], iteration_bounds = array<i64: 1, 1>, scalar_prefetch = 0 : i64, scratch_operands = 3 : i64, tpu.core_type = #tpu.core_type<tc>, window_params = [{transform_indices = @transform_0, window_bounds = array<i64: 8, 32>}, {transform_indices = @transform_1, window_bounds = array<i64: 8, 32>}, {transform_indices = @transform_2, window_bounds = array<i64: 8, 8>}, {pipeline_mode = #tpu.pipeline_mode<synchronous>, transform_indices = @transform_3, window_bounds = array<i64: 32, 256>}, {pipeline_mode = #tpu.pipeline_mode<synchronous>, transform_indices = @transform_4, window_bounds = array<i64: 1, 256>}, {pipeline_mode = #tpu.pipeline_mode<synchronous>, transform_indices = @transform_5, window_bounds = array<i64: 32, 256>}, {pipeline_mode = #tpu.pipeline_mode<synchronous>, transform_indices = @transform_6, window_bounds = array<i64: 1, 256>}, {pipeline_mode = #tpu.pipeline_mode<synchronous>, transform_indices = @transform_7, window_bounds = array<i64: 1, 32>}, {pipeline_mode = #tpu.pipeline_mode<synchronous>, transform_indices = @transform_8, window_bounds = array<i64: 128, 128>}, {transform_indices = @transform_9, window_bounds = array<i64: 8, 128>}]} {
    %c0_i32 = arith.constant 0 : i32
    %0 = arith.cmpi eq, %arg1, %c0_i32 : i32
    %1 = arith.extui %0 : i1 to i32
    %c0_i32_0 = arith.constant 0 : i32
    %2 = arith.cmpi ne, %1, %c0_i32_0 : i32
    scf.if %2 {
      %c0_21 = arith.constant 0 : index
      %c0_22 = arith.constant 0 : index
      %41 = vector.load %arg2[%c0_21, %c0_22] : memref<8x32xbf16, #tpu.memory_space<vmem>>, vector<8x32xbf16>
      %c0_23 = arith.constant 0 : index
      %c0_24 = arith.constant 0 : index
      %42 = vector.load %arg7[%c0_23, %c0_24] : memref<32x256xbf16, #tpu.memory_space<vmem>>, vector<32x256xbf16>
      %cst_25 = arith.constant dense<0.000000e+00> : vector<8x256xf32>
      %43 = tpu.matmul %41, %42, %cst_25 {dimension_numbers = #tpu.dot_dimension_numbers<[1], [0], [0], [1], [0, 0, 1, 1], [], []>} : vector<8x32xbf16>, vector<32x256xbf16>, vector<8x256xf32> -> vector<8x256xf32>
      %c0_26 = arith.constant 0 : index
      %c0_27 = arith.constant 0 : index
      %44 = vector.load %arg8[%c0_26, %c0_27] : memref<1x256xf32, #tpu.memory_space<vmem>>, vector<1x256xf32>
      %45 = vector.broadcast %44 : vector<1x256xf32> to vector<8x256xf32>
      %46 = arith.addf %43, %45 : vector<8x256xf32>
      %c0_28 = arith.constant 0 : index
      %c0_29 = arith.constant 0 : index
      %47 = vector.load %arg13[%c0_28, %c0_29] : memref<8x256xf32, #tpu.memory_space<vmem>>, vector<8x256xf32>
      tpu.vector_store %arg13[%c0_28, %c0_29], %46 {strides = array<i32>} : memref<8x256xf32, #tpu.memory_space<vmem>>, vector<8x256xf32>,
      %c0_30 = arith.constant 0 : index
      %c0_31 = arith.constant 0 : index
      %48 = vector.load %arg9[%c0_30, %c0_31] : memref<1x32xbf16, #tpu.memory_space<vmem>>, vector<1x32xbf16>
      %cst_32 = arith.constant dense<0.000000e+00> : vector<1x8xf32>
      %49 = tpu.matmul %48, %41, %cst_32 {dimension_numbers = #tpu.dot_dimension_numbers<[1], [1], [0], [0], [0, 0, 1, 0], [], []>} : vector<1x32xbf16>, vector<8x32xbf16>, vector<1x8xf32> -> vector<1x8xf32>
      %c0_33 = arith.constant 0 : index
      %c0_34 = arith.constant 0 : index
      %50 = vector.load %arg14[%c0_33, %c0_34] : memref<1x8xf32, #tpu.memory_space<vmem>>, vector<1x8xf32>
      tpu.vector_store %arg14[%c0_33, %c0_34], %49 {strides = array<i32>} : memref<1x8xf32, #tpu.memory_space<vmem>>, vector<1x8xf32>,
      %cst_35 = arith.constant 0.000000e+00 : f32
      %51 = vector.broadcast %cst_35 : f32 to vector<8x128xf32>
      %c0_36 = arith.constant 0 : index
      %c0_37 = arith.constant 0 : index
      %52 = vector.load %arg12[%c0_36, %c0_37] : memref<8x128xf32, #tpu.memory_space<vmem>>, vector<8x128xf32>
      tpu.vector_store %arg12[%c0_36, %c0_37], %51 {strides = array<i32>} : memref<8x128xf32, #tpu.memory_space<vmem>>, vector<8x128xf32>,
    } else {
    }
    %c0 = arith.constant 0 : index
    %c0_1 = arith.constant 0 : index
    %3 = vector.load %arg3[%c0, %c0_1] : memref<8x32xbf16, #tpu.memory_space<vmem>>, vector<8x32xbf16>
    %c0_2 = arith.constant 0 : index
    %c0_3 = arith.constant 0 : index
    %4 = vector.load %arg5[%c0_2, %c0_3] : memref<32x256xbf16, #tpu.memory_space<vmem>>, vector<32x256xbf16>
    %cst = arith.constant dense<0.000000e+00> : vector<8x256xf32>
    %5 = tpu.matmul %3, %4, %cst {dimension_numbers = #tpu.dot_dimension_numbers<[1], [0], [0], [1], [0, 0, 1, 1], [], []>} : vector<8x32xbf16>, vector<32x256xbf16>, vector<8x256xf32> -> vector<8x256xf32>
    %c0_4 = arith.constant 0 : index
    %c0_5 = arith.constant 0 : index
    %6 = vector.load %arg6[%c0_4, %c0_5] : memref<1x256xf32, #tpu.memory_space<vmem>>, vector<1x256xf32>
    %7 = vector.broadcast %6 : vector<1x256xf32> to vector<8x256xf32>
    %8 = arith.addf %5, %7 : vector<8x256xf32>
    %9 = vector.extract_strided_slice %8 {offsets = [0, 0], sizes = [8, 128], strides = [1, 1]} : vector<8x256xf32> to vector<8x128xf32>
    %10 = vector.extract_strided_slice %8 {offsets = [0, 128], sizes = [8, 1], strides = [1, 1]} : vector<8x256xf32> to vector<8x1xf32>
    %c0_6 = arith.constant 0 : index
    %c0_7 = arith.constant 0 : index
    %11 = vector.load %arg14[%c0_6, %c0_7] : memref<1x8xf32, #tpu.memory_space<vmem>>, vector<1x8xf32>
    %12 = vector.broadcast %10 : vector<8x1xf32> to vector<8x8xf32>
    %13 = vector.broadcast %11 : vector<1x8xf32> to vector<8x8xf32>
    %14 = arith.addf %12, %13 : vector<8x8xf32>
    %c0_8 = arith.constant 0 : index
    %c0_9 = arith.constant 0 : index
    %15 = vector.load %arg4[%c0_8, %c0_9] : memref<8x8xbf16, #tpu.memory_space<vmem>>, vector<8x8xbf16>
    %16 = arith.extf %15 : vector<8x8xbf16> to vector<8x8xf32>
    %17 = arith.negf %14 : vector<8x8xf32>
    %18 = math.exp %17 : vector<8x8xf32>
    %cst_10 = arith.constant 1.000000e+00 : f32
    %19 = vector.broadcast %cst_10 : f32 to vector<8x8xf32>
    %20 = arith.addf %19, %18 : vector<8x8xf32>
    %21 = arith.divf %19, %20 : vector<8x8xf32>
    %22 = arith.mulf %16, %21 : vector<8x8xf32>
    %c0_11 = arith.constant 0 : index
    %c0_12 = arith.constant 0 : index
    %23 = vector.load %arg13[%c0_11, %c0_12] : memref<8x256xf32, #tpu.memory_space<vmem>>, vector<8x128xf32>
    %24 = vector.shape_cast %9 : vector<8x128xf32> to vector<8x1x128xf32>
    %25 = vector.shape_cast %23 : vector<8x128xf32> to vector<1x8x128xf32>
    %26 = vector.broadcast %24 : vector<8x1x128xf32> to vector<8x8x128xf32>
    %27 = vector.broadcast %25 : vector<1x8x128xf32> to vector<8x8x128xf32>
    %28 = arith.addf %26, %27 : vector<8x8x128xf32>
    %cst_13 = arith.constant 0.000000e+00 : f32
    %29 = vector.broadcast %cst_13 : f32 to vector<8x8x128xf32>
    %30 = arith.maximumf %28, %29 : vector<8x8x128xf32>
    %c0_14 = arith.constant 0 : index
    %c0_15 = arith.constant 0 : index
    %31 = vector.load %arg12[%c0_14, %c0_15] : memref<8x128xf32, #tpu.memory_space<vmem>>, vector<8x128xf32>
    %32 = vector.shape_cast %22 : vector<8x8xf32> to vector<8x8x1xf32>
    %33 = vector.broadcast %32 : vector<8x8x1xf32> to vector<8x8x128xf32>
    %34 = arith.mulf %33, %30 : vector<8x8x128xf32>
    %cst_16 = arith.constant dense<0.000000e+00> : vector<8x128xf32>
    %35 = vector.multi_reduction <add>, %34, %cst_16 [0] : vector<8x8x128xf32> to vector<8x128xf32>
    %36 = arith.addf %31, %35 : vector<8x128xf32>
    %c0_17 = arith.constant 0 : index
    %c0_18 = arith.constant 0 : index
    %37 = vector.load %arg12[%c0_17, %c0_18] : memref<8x128xf32, #tpu.memory_space<vmem>>, vector<8x128xf32>
    tpu.vector_store %arg12[%c0_17, %c0_18], %36 {strides = array<i32>} : memref<8x128xf32, #tpu.memory_space<vmem>>, vector<8x128xf32>,
    %c0_i32_19 = arith.constant 0 : i32
    %38 = arith.cmpi eq, %arg1, %c0_i32_19 : i32
    %39 = arith.extui %38 : i1 to i32
    %c0_i32_20 = arith.constant 0 : i32
    %40 = arith.cmpi ne, %39, %c0_i32_20 : i32
    scf.if %40 {
      %c0_21 = arith.constant 0 : index
      %c128 = arith.constant 128 : index
      %41 = vector.load %arg13[%c0_21, %c128] : memref<8x256xf32, #tpu.memory_space<vmem>>, vector<8x128xf32>
      %c0_22 = arith.constant 0 : index
      %c0_23 = arith.constant 0 : index
      %42 = vector.load %arg12[%c0_22, %c0_23] : memref<8x128xf32, #tpu.memory_space<vmem>>, vector<8x128xf32>
      %c0_24 = arith.constant 0 : index
      %c0_25 = arith.constant 0 : index
      %43 = vector.load %arg10[%c0_24, %c0_25] : memref<128x128xf32, #tpu.memory_space<vmem>>, vector<128x128xf32>
      %cst_26 = arith.constant dense<0.000000e+00> : vector<8x128xf32>
      %44 = tpu.matmul %42, %43, %cst_26 {dimension_numbers = #tpu.dot_dimension_numbers<[1], [0], [0], [1], [0, 0, 1, 1], [], []>} : vector<8x128xf32>, vector<128x128xf32>, vector<8x128xf32> -> vector<8x128xf32>
      %45 = arith.addf %41, %44 : vector<8x128xf32>
      %cst_27 = arith.constant 0.000000e+00 : f32
      %46 = vector.broadcast %cst_27 : f32 to vector<8x128xf32>
      %47 = arith.maximumf %45, %46 : vector<8x128xf32>
      %c0_28 = arith.constant 0 : index
      %c0_29 = arith.constant 0 : index
      %48 = vector.load %arg11[%c0_28, %c0_29] : memref<8x128xf32, #tpu.memory_space<vmem>>, vector<8x128xf32>
      tpu.vector_store %arg11[%c0_28, %c0_29], %47 {strides = array<i32>} : memref<8x128xf32, #tpu.memory_space<vmem>>, vector<8x128xf32>,
    } else {
    }
    return
  }
  func.func @transform_0(%arg0: i32, %arg1: i32) -> (i32, i32) {
    %c0_i32 = arith.constant 0 : i32
    %c0_i32_0 = arith.constant 0 : i32
    return %arg0, %c0_i32 : i32, i32
  }
  func.func @transform_1(%arg0: i32, %arg1: i32) -> (i32, i32) {
    %c0_i32 = arith.constant 0 : i32
    %c0_i32_0 = arith.constant 0 : i32
    return %arg1, %c0_i32 : i32, i32
  }
  func.func @transform_2(%arg0: i32, %arg1: i32) -> (i32, i32) {
    %c0_i32 = arith.constant 0 : i32
    return %arg1, %arg0 : i32, i32
  }
  func.func @transform_3(%arg0: i32, %arg1: i32) -> (i32, i32) {
    %c0_i32 = arith.constant 0 : i32
    %c0_i32_0 = arith.constant 0 : i32
    %c0_i32_1 = arith.constant 0 : i32
    return %c0_i32, %c0_i32_0 : i32, i32
  }
  func.func @transform_4(%arg0: i32, %arg1: i32) -> (i32, i32) {
    %c0_i32 = arith.constant 0 : i32
    %c0_i32_0 = arith.constant 0 : i32
    %c0_i32_1 = arith.constant 0 : i32
    return %c0_i32, %c0_i32_0 : i32, i32
  }
  func.func @transform_5(%arg0: i32, %arg1: i32) -> (i32, i32) {
    %c0_i32 = arith.constant 0 : i32
    %c0_i32_0 = arith.constant 0 : i32
    %c0_i32_1 = arith.constant 0 : i32
    return %c0_i32, %c0_i32_0 : i32, i32
  }
  func.func @transform_6(%arg0: i32, %arg1: i32) -> (i32, i32) {
    %c0_i32 = arith.constant 0 : i32
    %c0_i32_0 = arith.constant 0 : i32
    %c0_i32_1 = arith.constant 0 : i32
    return %c0_i32, %c0_i32_0 : i32, i32
  }
  func.func @transform_7(%arg0: i32, %arg1: i32) -> (i32, i32) {
    %c0_i32 = arith.constant 0 : i32
    %c0_i32_0 = arith.constant 0 : i32
    %c0_i32_1 = arith.constant 0 : i32
    return %c0_i32, %c0_i32_0 : i32, i32
  }
  func.func @transform_8(%arg0: i32, %arg1: i32) -> (i32, i32) {
    %c0_i32 = arith.constant 0 : i32
    %c0_i32_0 = arith.constant 0 : i32
    %c0_i32_1 = arith.constant 0 : i32
    return %c0_i32, %c0_i32_0 : i32, i32
  }
  func.func @transform_9(%arg0: i32, %arg1: i32) -> (i32, i32) {
    %c0_i32 = arith.constant 0 : i32
    %c0_i32_0 = arith.constant 0 : i32
    return %arg0, %c0_i32 : i32, i32
  }
}

</mosaic_0001>

<bundles_post_ra>
// kernel: tpu_custom_call.1
= control target key start
LH: loop header
LB: loop body
LE: loop exit
PB: predicated region body
PF: predicated region fallthrough
CT: control target
= control target key end

     0   :  { %14 = vsyncpa [#allocation6], 0  ;;  %s851_s0 = inlined_call_operand.hbm [shape: bf16[8,32], index: 0, kind: input, shape index: {}]   ;;  %s852_s1 = inlined_call_operand.hbm [shape: bf16[8,32], index: 1, kind: input, shape index: {}]   ;;  %s853_s2 = inlined_call_operand.hbm [shape: bf16[8,8], index: 2, kind: input, shape index: {}]   ;;  %s854_s3 = inlined_call_operand.hbm [shape: bf16[32,256], index: 3, kind: input, shape index: {}]   ;;  %s855_s4 = inlined_call_operand.vmem [shape: f32[1,256], index: 4, kind: input, shape index: {}]   ;;  %s856_s5 = inlined_call_operand.hbm [shape: bf16[32,256], index: 5, kind: input, shape index: {}]   ;;  %s857_s6 = inlined_call_operand.vmem [shape: f32[1,256], index: 6, kind: input, shape index: {}]   ;;  %s858_s7 = inlined_call_operand.vmem [shape: bf16[1,32], index: 7, kind: input, shape index: {}]   ;;  %s859_s8 = inlined_call_operand.hbm [shape: f32[128,128], index: 8, kind: input, shape index: {}]   ;;  %s860_s9 = inlined_call_operand.hbm [shape: f32[8,128], index: 9, kind: output, shape index: {}]  }
   0x1   :  { %15 = vsyncpa [#allocation9], 0 }
   0x2   :  { %16 = vsyncpa [#allocation12], 0 }
   0x3   :  { %17 = vsyncpa [#allocation15], 0  ;;  %s35_s11 = sshll.u32 %s852_s1, 4  ;;  %s36_s11 = int_to_ptr.hbm [resolvable:$true] %s35_s11 }
   0x4   :  { %18 = vsyncpa [#allocation7], 0  ;;  %s724_s12 = smov [#allocation8]   ;;  %s56_s16 = sshll.u32 %s854_s3, 4  ;;  %s57_s16 = int_to_ptr.hbm [resolvable:$true] %s56_s16 }
   0x5   :  { %s37_s13 = sshll.u32 %s724_s12, 4  ;;  %s725_s17 = smov [#allocation11]   ;;  %s38_s13 = int_to_ptr.vmem [resolvable:$true] %s37_s13 }
   0x6   :  { %40 = dma.hbm_to_vmem [thread:$0]  %s36_s11, 64, %s38_s13, [#allocation9]  }
   0x7   :  { %s58_s18 = sshll.u32 %s725_s17, 4  ;;  %s726_s19 = smov 128   ;;  %s59_s18 = int_to_ptr.vmem [resolvable:$true] %s58_s18 }
   0x8   :  { %s727_s20 = smov 8   ;;  %s24_s1 = sshll.u32 %s851_s0, 4  ;;  %s25_s1 = int_to_ptr.hbm [resolvable:$true] %s24_s1 }
   0x9   :  { %64 = dma.hbm_to_vmem [thread:$0]  %s57_s16, 512, %s59_s18, [#allocation12], %s726_s19, %s726_s19, %s727_s20  }
   0xa   :  { %s728_s23 = smov [#allocation5]   ;;  %s46_s3 = sshll.u32 %s853_s2, 4  ;;  %s47_s3 = int_to_ptr.hbm [resolvable:$true] %s46_s3 }
   0xb   :  { %s26_s24 = sshll.u32 %s728_s23, 4  ;;  %s729_s27 = smov [#allocation10]   ;;  %s27_s24 = int_to_ptr.vmem [resolvable:$true] %s26_s24 }
   0xc   :  { %29 = dma.hbm_to_vmem [thread:$0]  %s25_s1, 64, %s27_s24, [#allocation6]  }
   0xd   :  { %s48_s28 = sshll.u32 %s729_s27, 4  ;;  %s71_s10 = sshll.u32 %s856_s5, 4  ;;  %s49_s28 = int_to_ptr.vmem [resolvable:$true] %s48_s28  ;;  %s72_s10 = int_to_ptr.hbm [resolvable:$true] %s71_s10 }
   0xe   :  { %51 = dma.hbm_to_vmem [thread:$0]  %s47_s3, 64, %s49_s28, [#allocation9]  }
   0xf   :  { %s88_s12 = sshll.u32 %s859_s8, 4  ;;  %s730_s13 = smov [#allocation13]   ;;  %s89_s12 = int_to_ptr.hbm [resolvable:$true] %s88_s12 }
  0x10   :  { %s73_s14 = sshll.u32 %s730_s13, 4  ;;  %s731_s2 = smov [#allocation14]   ;;  %s74_s14 = int_to_ptr.vmem [resolvable:$true] %s73_s14 }
  0x11   :  { %79 = dma.hbm_to_vmem [thread:$0]  %s72_s10, 512, %s74_s14, [#allocation12], %s726_s19, %s726_s19, %s727_s20  }
  0x12   :  { %s90_s15 = sshll.u32 %s731_s2, 4  ;;  %s91_s15 = int_to_ptr.vmem [resolvable:$true] %s90_s15 }
  0x13   :  { %96 = dma.hbm_to_vmem [thread:$0]  %s89_s12, 2048, %s91_s15, [#allocation15], %s726_s19, %s726_s19, %s727_s20  }
  0x14   :  { %714 = dma.done.wait [#allocation6], 64  }
  0x15   :  { %715 = vsyncadd [#allocation6], 4294967232 }
  0x16   :  { %716 = dma.done.wait [#allocation9], 128  }
  0x17   :  { %717 = vsyncadd [#allocation9], 4294967168 }
  0x18   :  { %718 = dma.done.wait [#allocation12], 1024  }
  0x19   :  { %719 = vsyncadd [#allocation12], 4294966272 }
  0x1a   :  { %720 = dma.done.wait [#allocation15], 2048  }
  0x1b   :  { %721 = vsyncadd [#allocation15], 4294965248  ;;  %v491_v0 = vld [vmem:[#allocation13 + $0x10] sm:$0xf]  ;;  %v522_v1 = vld [vmem:[#allocation13 + $0x14] sm:$0xf0] }
  0x1c   :  { %v510_v2 = vld [vmem:[#allocation11 + $0x10] sm:$0xf]  ;;  %v492_v3 = vor.u32 %v522_v1, %v491_v0  ;;  %v526_v4 = vld [vmem:[#allocation11 + $0x14] sm:$0xf0]  ;;  %v483_v5 = vld [vmem:[#allocation13] sm:$0xf] }
  0x1d   :  { %v520_v6 = vld [vmem:[#allocation13 + $0x4] sm:$0xf0]  ;;  %v511_v7 = vor.u32 %v526_v4, %v510_v2  ;;  %v502_v8 = vld [vmem:[#allocation11] sm:$0xf]  ;;  %v525_v11 = vld [vmem:[#allocation11 + $0x14] sm:$0xf] }
  0x1e   :  { %v524_v9 = vld [vmem:[#allocation11 + $0x4] sm:$0xf0]  ;;  %167 = vmatpush.bf16.msra.mxu0 %v492_v3  ;;  %v484_v10 = vor.u32 %v520_v6, %v483_v5  ;;  %v512_v12 = vld [vmem:[#allocation11 + $0x18] sm:$0xf0]  ;;  %v521_v15 = vld [vmem:[#allocation13 + $0x14] sm:$0xf]  ;;  %v345_v6 = vlaneseq }
  0x1f   :  { %250 = vmatpush.bf16.msra.mxu3 %v511_v7  ;;  %v503_v13 = vor.u32 %v524_v9, %v502_v8  ;;  %v515_v14 = vor.u32 %v525_v11, %v512_v12  ;;  %v523_v16 = vld [vmem:[#allocation11 + $0x4] sm:$0xf]  ;;  %v504_v17 = vld [vmem:[#allocation11 + $0x8] sm:$0xf0]  ;;  %v493_v18 = vld [vmem:[#allocation13 + $0x18] sm:$0xf0] }
  0x20   :  { %v496_v19 = vor.u32 %v521_v15, %v493_v18  ;;  %v519_v20 = vld [vmem:[#allocation13 + $0x4] sm:$0xf]  ;;  %v485_v21 = vld [vmem:[#allocation13 + $0x8] sm:$0xf0]  ;;  %v126_v22 = vld [vmem:[#allocation5] sm:$0xf]  ;;  %v507_v24 = vor.u32 %v523_v16, %v504_v17 }
  0x21   :  { %vm157_vm0 = vcmask 261120   ;;  %v209_v23 = vld [vmem:[#allocation8] sm:$0xf]  ;;  %v488_v25 = vor.u32 %v519_v20, %v485_v21  ;;  %v189_v27 = vld [vmem:[%s858_s7] sm:$0x1]  ;;  %v732_v28 = vmov 0  }
  0x22   :  { %168 = vmatpush.bf16.msra.mxu0 %v484_v10  ;;  %180 = vmatpush.bf16.msra.mxu2 %v496_v19  ;;  %v159_v26 = vsel %vm157_vm0, %v126_v22, 0  ;;  %v214_v30 = vld [vmem:[%s855_s4] sm:$0x3]  ;;  %vm206_vm1 = vcmask 57344   ;;  %v346_v7 = vshrl.u32 %v345_v6, 7  ;;  %s733_s4 = smov [#allocation16]  }
  0x23   :  { %251 = vmatpush.bf16.msra.mxu3 %v503_v13  ;;  %537 = vset.pattern.permute.xlu0 %v732_v28  ;;  %v817_v31 = vld [vmem:[%s857_s6] sm:$0x3]  ;;  %v216_v32 = vperm.slane %v214_v30, 0  ;;  %v217_v51 = vperm.slane %v214_v30, 1  ;;  %v280_v17 = vld [vmem:[#allocation10] sm:$0xf] }
  0x24   :  { %v133_v33 = vperm.slane %v817_v31, 0  ;;  %540 = vset.pattern.permute.xlu2 %v346_v7  ;;  %539 = vset.pattern.permute.xlu1 %v346_v7  ;;  %v281_v21 = vunpack.c.l.bf16 %v280_v17  ;;  %s466_s6 = sshll.u32 %s733_s4, 4  ;;  %s468_s21 = sshll.u32 %s860_s9, 4  ;;  %s467_s6 = int_to_ptr.vmem [resolvable:$true] %s466_s6  ;;  %s469_s21 = int_to_ptr.hbm [resolvable:$true] %s468_s21 }
  0x25   :  { %497 = vmatmul.msk.bf16.vlgmr.msra.gmra.mxu0 %vm157_vm0, %v126_v22 }
  0x26   :  { %263 = vmatpush.bf16.msrb.mxu0 %v515_v14  ;;  %516 = vmatmul.msk.bf16.vlgmr.msra.gmra.mxu3 %vm157_vm0, %v209_v23 }
  0x27   :  { %181 = vmatpush.bf16.msra.mxu2 %v488_v25 }
  0x2a   :  { %264 = vmatpush.bf16.msrb.mxu0 %v507_v24  ;;  %498 = vmatmul.msk.bf16.vlgmr.msra.gmra.mxu2 %vm157_vm0, %v126_v22 }
  0x2b   :  { %200 = vmatpush.bf16.xpose.msrb.mxu2 %v159_v26 }
  0x35   :  { %517 = vmatmul.msk.bf16.vlgmr.msrb.gmra.mxu0 %vm157_vm0, %v209_v23 }
  0x3a   :  { %499 = vmatmul.msk.bf16.vlgmr.msrb.gmra.mxu2 %vm157_vm0, %v189_v27 }
  0xa2   :  { %v170_v29 = vpop.f32.mrf.mxu0 }
  0xa3   :  { %v171_v37 = vadd.f32 %v170_v29, %v133_v33 }
  0xa9   :  { %v253_v34 = vpop.f32.mrf.mxu3 }
  0xaa   :  { %v254_v35 = vadd.f32 %v253_v34, %v216_v32  ;;  %v172_v36 = vpop.f32.mrf.mxu0 }
  0xab   :  { %v437_v36 = vld [vmem:[#allocation14 + $0x78] sm:$0xff] }
  0xac   :  { %v306_v38 = vrot.slane %v254_v35, 3  ;;  %v307_v39 = vrot.slane %v254_v35, 4  ;;  %v309_v40 = vrot.slane %v254_v35, 6  ;;  %v304_v41 = vrot.slane %v254_v35, 1  ;;  %438 = vmatpush.msra.mxu1 %v437_v36 }
  0xad   :  { %v311_v42 = vperm.slane %v254_v35, 0  ;;  %v305_v43 = vrot.slane %v254_v35, 2  ;;  %v310_v44 = vrot.slane %v254_v35, 7  ;;  %v308_v45 = vrot.slane %v254_v35, 5  ;;  %v820_v46 = vpop.f32.mrf.mxu2 }
  0xae   :  { %v314_v47 = vperm.slane %v306_v38, 0  ;;  %v315_v48 = vperm.slane %v307_v39, 0  ;;  %v317_v49 = vperm.slane %v309_v40, 0  ;;  %v312_v50 = vperm.slane %v304_v41, 0  ;;  %v435_v38 = vld [vmem:[#allocation14 + $0x68] sm:$0xff]  ;;  %v434_v39 = vld [vmem:[#allocation14 + $0x60] sm:$0xff] }
  0xaf   :  { %v822_v52 = vadd.f32 %v311_v42, %v171_v37  ;;  %v313_v53 = vperm.slane %v305_v43, 0  ;;  %v318_v54 = vperm.slane %v310_v44, 0  ;;  %v316_v62 = vperm.slane %v308_v45, 0  ;;  %v433_v40 = vld [vmem:[#allocation14 + $0x58] sm:$0xff]  ;;  %v432_v41 = vld [vmem:[#allocation14 + $0x50] sm:$0xff]  ;;  %v431_v42 = vld [vmem:[#allocation14 + $0x48] sm:$0xff] }
  0xb0   :  { %v824_v55 = vadd.f32 %v314_v47, %v171_v37  ;;  %v826_v56 = vadd.f32 %v315_v48, %v171_v37  ;;  %v828_v57 = vadd.f32 %v317_v49, %v171_v37  ;;  %v830_v58 = vadd.f32 %v312_v50, %v171_v37  ;;  %v430_v43 = vld [vmem:[#allocation14 + $0x40] sm:$0xff]  ;;  %v429_v44 = vld [vmem:[#allocation14 + $0x38] sm:$0xff]  ;;  %v428_v45 = vld [vmem:[#allocation14 + $0x30] sm:$0xff] }
  0xb1   :  { %v255_v59 = vpop.f32.mrf.mxu3  ;;  %v832_v60 = vadd.f32 %v313_v53, %v171_v37  ;;  %v834_v61 = vadd.f32 %v318_v54, %v171_v37  ;;  %v836_v1 = vadd.f32 %v316_v62, %v171_v37  ;;  %v436_v37 = vld [vmem:[#allocation14 + $0x70] sm:$0xff]  ;;  %v427_v47 = vld [vmem:[#allocation14 + $0x28] sm:$0xff]  ;;  %v426_v48 = vld [vmem:[#allocation14 + $0x20] sm:$0xff] }
  0xb2   :  { %v266_v63 = vpop.f32.mrf.mxu0  ;;  %439 = vmatpush.msra.mxu1 %v436_v37  ;;  %v425_v49 = vld [vmem:[#allocation14 + $0x18] sm:$0xff]  ;;  %v424_v50 = vld [vmem:[#allocation14 + $0x10] sm:$0xff]  ;;  %v422_v53 = vld [vmem:[#allocation14] sm:$0xff]  ;;  %v336_v59 = vmax.f32 %v830_v58, 0.0  ;;  %v341_v17 = vmax.f32 %v828_v57, 0.0 }
  0xb3   :  { %v267_v0 = vadd.f32 %v266_v63, %v217_v51  ;;  %v423_v51 = vld [vmem:[#allocation14 + $0x8] sm:$0xff]  ;;  %v335_v63 = vmax.f32 %v822_v52, 0.0  ;;  %v337_v6 = vmax.f32 %v832_v60, 0.0 }
  0xb4   :  { %440 = vmatpush.msra.mxu1 %v435_v38 }
  0xb5   :  { %273 = vperm.xlu0 %537, %v267_v0   ;;  %v185_v2 = vpop.f32.mrf.mxu2 }
  0xb6   :  { %441 = vmatpush.msra.mxu1 %v434_v39 }
  0xb8   :  { %442 = vmatpush.msra.mxu1 %v433_v40 }
  0xba   :  { %v268_v3 = vpop.f32.mrf.mxu0  ;;  %443 = vmatpush.msra.mxu1 %v432_v41 }
  0xbc   :  { %444 = vmatpush.msra.mxu1 %v431_v42 }
  0xbd   :  { %v202_v4 = vpop.f32.mrf.mxu2  ;;  %538 = vset.pattern.permute.xlu0 %v346_v7 }
  0xbe   :  { %207 = vst.msk [vmem:[#allocation4] sm:$0x1] %vm206_vm1, %v202_v4  ;;  %445 = vmatpush.msra.mxu1 %v430_v43 }
  0xc0   :  { %446 = vmatpush.msra.mxu1 %v429_v44 }
  0xc2   :  { %447 = vmatpush.msra.mxu1 %v428_v45 }
  0xc4   :  { %448 = vmatpush.msra.mxu1 %v427_v47 }
  0xc5   :  { %v204_v5 = vpop.f32.mrf.mxu2  ;;  %v541_v8 = vld [vmem:[#allocation4] ss:$0 sm:$0xff] }
  0xc6   :  { %449 = vmatpush.msra.mxu1 %v426_v48 }
  0xc8   :  { %450 = vmatpush.msra.mxu1 %v425_v49 }
  0xca   :  { %451 = vmatpush.msra.mxu1 %v424_v50 }
  0xcc   :  { %452 = vmatpush.msra.mxu1 %v423_v51 }
  0xce   :  { %453 = vmatpush.msra.mxu1 %v422_v53 }
 0x127   :  { %v274_v9 = vpop.permute.xlu0 %273 }
 0x128   :  { %v279_v10 = vadd.f32 %v541_v8, %v274_v9  ;;  %v338_v8 = vmax.f32 %v824_v55, 0.0 }
 0x12a   :  { %v518_v11 = vmul.f32 -1.442695, %v279_v10 }
 0x12c   :  { %542 = vpow2.f32 %v518_v11  ;;  %v339_v11 = vmax.f32 %v826_v56, 0.0  ;;  %v134_v56 = vperm.slane %v817_v31, 1 }
 0x132   :  { %v543_v12 = vpop.eup %542 }
 0x133   :  { %v285_v13 = vadd.f32 1.0, %v543_v12 }
 0x135   :  { %544 = vrcp.f32 %v285_v13  ;;  %v297_v18 = vand.u32 2147483648, %v285_v13  ;;  %v295_v20 = vand.u32 2147483647, %v285_v13  ;;  %vm291_vm3 = vweird.f32 %v285_v13 }
 0x137   :  { %v298_v23 = vor.u32 1.1754944e-38, %v297_v18  ;;  %vm296_vm5 = vcmp.eq.f32.partialorder %v295_v20, 8.507059e+37  ;;  %v342_v20 = vmax.f32 %v834_v61, 0.0 }
 0x13b   :  { %v545_v14 = vpop.eup %544 }
 0x13c   :  { %v287_v15 = vmul.f32 %v545_v14, %v285_v13  ;;  %vm292_vm2 = vweird.f32 %v545_v14 }
 0x13d   :  { %vm293_vm4 = vmor %vm291_vm3, %vm292_vm2 }
 0x13e   :  { %v288_v16 = vsub.f32 1.0, %v287_v15 }
 0x140   :  { %v289_v19 = vmul.f32 %v545_v14, %v288_v16 }
 0x142   :  { %v290_v22 = vadd.f32 %v545_v14, %v289_v19 }
 0x144   :  { %v294_v24 = vsel %vm293_vm4, %v545_v14, %v290_v22  ;;  %v340_v14 = vmax.f32 %v836_v1, 0.0 }
 0x145   :  { %v299_v25 = vsel %vm296_vm5, %v298_v23, %v294_v24  ;;  %v184_v24 = vadd.f32 %v820_v46, %v134_v56 }
 0x146   :  { %v301_v26 = vmul.f32 %v299_v25, %v281_v21 }
 0x148   :  { %v365_v27 = vperm.slane %v301_v26, 3  ;;  %v351_v28 = vperm.slane %v301_v26, 1  ;;  %v344_v29 = vperm.slane %v301_v26, 0  ;;  %v372_v30 = vperm.slane %v301_v26, 4 }
 0x149   :  { %v358_v32 = vperm.slane %v301_v26, 2  ;;  %v393_v33 = vperm.slane %v301_v26, 7  ;;  %v386_v34 = vperm.slane %v301_v26, 6  ;;  %v379_v35 = vperm.slane %v301_v26, 5 }
 0x14a   :  { %370 = vperm.xlu2 %540, %v365_v27   ;;  %356 = vperm.xlu1 %539, %v351_v28  }
 0x14b   :  { %349 = vperm.xlu0 %538, %v344_v29  }
 0x152   :  { %377 = vperm.xlu2 %540, %v372_v30   ;;  %363 = vperm.xlu1 %539, %v358_v32  }
 0x153   :  { %398 = vperm.xlu0 %538, %v393_v33  }
 0x15a   :  { %391 = vperm.xlu2 %540, %v386_v34   ;;  %384 = vperm.xlu1 %539, %v379_v35  }
 0x1a4   :  { %v371_v54 = vpop.permute.xlu2 %370 }
 0x1a5   :  { %v403_v10 = vmul.f32 %v371_v54, %v338_v8 }
 0x1ac   :  { %v378_v5 = vpop.permute.xlu2 %377 }
 0x1ad   :  { %v404_v13 = vmul.f32 %v378_v5, %v339_v11 }
 0x1b4   :  { %v392_v15 = vpop.permute.xlu2 %391 }
 0x1b5   :  { %v406_v60 = vmul.f32 %v392_v15, %v341_v17 }
 0x1bc   :  { %v357_v62 = vpop.permute.xlu1 %356 }
 0x1bd   :  { %v401_v0 = vmul.f32 %v357_v62, %v336_v59  ;;  %v350_v2 = vpop.permute.xlu0 %349 }
 0x1be   :  { %v400_v3 = vmul.f32 %v350_v2, %v335_v63 }
 0x1c0   :  { %v408_v4 = vadd.f32 %v401_v0, %v400_v3 }
 0x1c4   :  { %v364_v7 = vpop.permute.xlu1 %363 }
 0x1c5   :  { %v402_v9 = vmul.f32 %v364_v7, %v337_v6  ;;  %v399_v19 = vpop.permute.xlu0 %398 }
 0x1c6   :  { %v407_v21 = vmul.f32 %v399_v19, %v342_v20 }
 0x1c7   :  { %v409_v12 = vadd.f32 %v408_v4, %v402_v9 }
 0x1c9   :  { %v410_v58 = vadd.f32 %v409_v12, %v403_v10 }
 0x1cb   :  { %v411_v52 = vadd.f32 %v410_v58, %v404_v13 }
 0x1cc   :  { %v385_v16 = vpop.permute.xlu1 %384 }
 0x1cd   :  { %v405_v18 = vmul.f32 %v385_v16, %v340_v14 }
 0x1cf   :  { %v412_v55 = vadd.f32 %v411_v52, %v405_v18 }
 0x1d1   :  { %v413_v22 = vadd.f32 %v412_v55, %v406_v60 }
 0x1d3   :  { %v414_v23 = vadd.f32 %v413_v22, %v407_v21 }
 0x1d5   :  { %454 = vmatmul.f32.vlgmr.msra.gmra.mxu1 %v414_v23 }
 0x252   :  { %v455_v1 = vpop.f32.mrf.mxu1 }
 0x253   :  { %v458_v57 = vadd.f32 %v455_v1, %v184_v24 }
 0x255   :  { %v459_v25 = vmax.f32 %v458_v57, 0.0 }
 0x257   :  { %460 = vst [vmem:[#allocation16] sm:$0xff] %v459_v25 }
 0x258   :  { %471 = dma.vmem_to_hbm [thread:$0]  %s467_s6, 128, %s469_s21, [#allocation7]  }
 0x259   :  { %722 = dma.done.wait [#allocation7], 128  }
 0x25a   :  { %723 = vsyncadd [#allocation7], 4294967168 }
 0x25b   :  { %476 = vsyncpa [#allocation6], 1 }
 0x25c   :  { %477 = vsyncpa [#allocation9], 1 }
 0x25d   :  { %478 = vsyncpa [#allocation12], 1 }
 0x25e   :  { %479 = vsyncpa [#allocation15], 1 }
 0x25f   :  { %480 = vsyncpa [#allocation7], 1 }

</bundles_post_ra>
